<compile_context>
chip_gen: v6e
topology: v6e:2x2x1
jax: 0.10.0
libtpu: 0.0.40
codegen_flags: <defaults>
</compile_context>

<pallas_src>
import math
import functools

import jax
import jax.numpy as jnp
from jax import lax
from jax.experimental import pallas as pl
from jax.experimental.pallas import tpu as pltpu

_LN_EPS = 1e-5  # torch.nn.LayerNorm default


# --------------------------------------------------------------------------- #
# Small helpers
# --------------------------------------------------------------------------- #
_SINGLE_BUFFER_OK = None


def _single_buffer_supported():
    """Probe once whether pipeline_mode=pl.Buffered(1) lowers on this jax/libtpu."""
    global _SINGLE_BUFFER_OK
    if _SINGLE_BUFFER_OK is None:
        try:
            if not hasattr(pl, "Buffered"):
                raise TypeError("no pl.Buffered")
            spec = pl.BlockSpec((8, 128), lambda i: (0, 0),
                                pipeline_mode=pl.Buffered(1))

            def _probe(x_ref, o_ref):
                o_ref[...] = x_ref[...] + 1.0

            x = jnp.zeros((8, 128), jnp.float32)
            out = pl.pallas_call(
                _probe, out_shape=jax.ShapeDtypeStruct((8, 128), jnp.float32),
                grid=(1,), in_specs=[spec],
                out_specs=pl.BlockSpec((8, 128), lambda i: (0, 0)))(x)
            jax.block_until_ready(out)
            _SINGLE_BUFFER_OK = True
        except Exception:
            _SINGLE_BUFFER_OK = False
    return _SINGLE_BUFFER_OK


def _bspec(block_shape, index_map, *, single_buffer=False):
    """BlockSpec; constant-index (grid-invariant) blocks can be single-buffered to
    halve their VMEM residency (headroom matters most on v7x's 64 MiB VMEM)."""
    if single_buffer and _single_buffer_supported():
        return pl.BlockSpec(block_shape, index_map, pipeline_mode=pl.Buffered(1))
    return pl.BlockSpec(block_shape, index_map)


def _vmem_limit_bytes():
    """~3/4 of physical VMEM, capped: ~96 MiB on v5e/v6e (128 MiB), ~48 MiB on v7x."""
    try:
        cap = int(pltpu.get_tpu_info().vmem_capacity_bytes)
    except Exception:
        cap = 128 * 1024 * 1024
    return min(100 * 1024 * 1024, (cap * 3) // 4)


def _pick_tile(total, target):
    if total <= target:
        return total
    if total % target == 0:
        return target
    return total  # fall back to one full block (trivially satisfies the (8,128) rule)


def _heads_per_group(num_heads, head_dim, hidden_dim, max_lanes=256):
    """Largest head group G with G*head_dim lane-aligned (%128) and <= max_lanes;
    if hidden_dim is small or nothing aligns, take all heads (Gd == H, always legal)."""
    if hidden_dim <= max_lanes:
        return num_heads
    for g in range(num_heads, 0, -1):
        gd = g * head_dim
        if num_heads % g == 0 and gd <= max_lanes and gd % 128 == 0:
            return g
    return num_heads


# --------------------------------------------------------------------------- #
# Kernel A: fused Q/K/V projection (computed once per token, bf16 outputs)
# --------------------------------------------------------------------------- #
def _qkv_proj_kernel(x_ref, wq_ref, wk_ref, wv_ref, bq_ref, bk_ref, bv_ref,
                     q_out, k_out, v_out):
    xb = x_ref[...].astype(jnp.bfloat16)                       # [TR, H]
    q = jnp.dot(xb, wq_ref[...], preferred_element_type=jnp.float32) + bq_ref[...]
    k = jnp.dot(xb, wk_ref[...], preferred_element_type=jnp.float32) + bk_ref[...]
    v = jnp.dot(xb, wv_ref[...], preferred_element_type=jnp.float32) + bv_ref[...]
    q_out[...] = q.astype(q_out.dtype)                         # 1/sqrt(hd) folded in
    k_out[...] = k.astype(k_out.dtype)
    v_out[...] = v.astype(v_out.dtype)


# --------------------------------------------------------------------------- #
# Kernel B: attention (head-group reduction) + Wo + residual + LayerNorm
# --------------------------------------------------------------------------- #
def _attn_kernel(q_ref, k_ref, v_ref, xres_ref, wo_ref, bo_ref, ln_g_ref, ln_b_ref,
                 mask_ref, out_ref, acc_ref, *, heads_per_group, head_dim, ln_eps):
    gi = pl.program_id(2)                          # head-group axis (reduction, last)

    @pl.when(gi == 0)
    def _():
        acc_ref[...] = jnp.zeros_like(acc_ref)

    q = q_ref[0]                                   # [TQ, Gd] bf16 (pre-scaled)
    k = k_ref[0]                                   # [S,  Gd] bf16
    v = v_ref[0]                                   # [S,  Gd] bf16
    mask = mask_ref[0]                             # [1, S] f32 additive

    ctx_parts = []
    for h in range(heads_per_group):               # short static unroll
        lo = h * head_dim
        hi = lo + head_dim
        # scores = q_h @ k_h^T without an explicit transpose (contract dim 1 of both)
        s = lax.dot_general(q[:, lo:hi], k[:, lo:hi],
                            dimension_numbers=(((1,), (1,)), ((), ())),
                            preferred_element_type=jnp.float32)     # [TQ, S]
        s = s + mask
        s = s - jnp.max(s, axis=-1, keepdims=True)
        p = jnp.exp(s)
        # reciprocal on the EUP slot (approx ~1e-3 rel; fine at bf16 tolerance)
        p = p * pl.reciprocal(jnp.sum(p, axis=-1, keepdims=True), approx=True)
        # TODO(synk): attention dropout skipped (eval-mode identity).
        ctx_parts.append(
            jnp.dot(p.astype(jnp.bfloat16), v[:, lo:hi],
                    preferred_element_type=jnp.float32).astype(jnp.bfloat16))
    ctx = ctx_parts[0] if heads_per_group == 1 else jnp.concatenate(ctx_parts, axis=-1)

    # attention-output projection folded into the head-group reduction:
    #   ctx_full @ Wo^T == sum_g ctx_group @ Wo^T[group rows, :]   (Gd-wide contraction)
    acc_ref[...] += jnp.dot(ctx, wo_ref[0], preferred_element_type=jnp.float32)

    @pl.when(gi == pl.num_programs(2) - 1)
    def _():
        y = acc_ref[...] + bo_ref[...] + xres_ref[0]            # bias + residual (f32)
        mu = jnp.mean(y, axis=-1, keepdims=True)
        yc = y - mu
        var = jnp.mean(yc * yc, axis=-1, keepdims=True)
        yn = yc * lax.rsqrt(var + ln_eps)
        out_ref[0] = (yn * ln_g_ref[...] + ln_b_ref[...]).astype(out_ref.dtype)


# --------------------------------------------------------------------------- #
# Kernel C: intermediate FC + erf GELU + output FC (I tiled) + residual + LayerNorm
# --------------------------------------------------------------------------- #
def _erf_poly(x):
    # Abramowitz & Stegun 7.1.26 rational erf approximation (|err| <= 1.5e-7), built
    # from Mosaic-friendly elementwise ops; the divide goes to the EUP slot.
    # TODO(synk): a bf16 polynomial would halve VALU work on v6e/v7x; kept f32 for v5e.
    a1, a2, a3, a4, a5 = (0.254829592, -0.284496736, 1.421413741,
                          -1.453152027, 1.061405429)
    p = 0.3275911
    s = jnp.where(x >= 0.0, 1.0, -1.0)
    a = jnp.abs(x)
    t = pl.reciprocal(1.0 + p * a, approx=True)
    poly = ((((a5 * t + a4) * t + a3) * t + a2) * t + a1) * t
    return s * (1.0 - poly * jnp.exp(-a * a))


def _gelu_erf(x):
    # torch's exact erf-gelu (NOT the tanh/GPT variant), approximated in-kernel.
    return 0.5 * x * (1.0 + _erf_poly(x * (1.0 / math.sqrt(2.0))))


def _ffn_kernel(x_ref, w1_ref, b1_ref, w2_ref, b2_ref, ln_g_ref, ln_b_ref,
                out_ref, acc_ref, *, ln_eps):
    ii = pl.program_id(1)                          # intermediate-dim tile (reduction)

    @pl.when(ii == 0)
    def _():
        acc_ref[...] = jnp.zeros_like(acc_ref)

    xb = x_ref[...].astype(jnp.bfloat16)                                   # [TR, H]
    h1 = jnp.dot(xb, w1_ref[...], preferred_element_type=jnp.float32) + b1_ref[...]
    h1 = _gelu_erf(h1)                                                     # [TR, TI]
    acc_ref[...] += jnp.dot(h1.astype(jnp.bfloat16), w2_ref[...],
                            preferred_element_type=jnp.float32)            # [TR, H]

    @pl.when(ii == pl.num_programs(1) - 1)
    def _():
        # TODO(synk): output dropout skipped (eval-mode identity).
        y = acc_ref[...] + b2_ref[...] + x_ref[...]             # bias + residual
        mu = jnp.mean(y, axis=-1, keepdims=True)
        yc = y - mu
        var = jnp.mean(yc * yc, axis=-1, keepdims=True)
        yn = yc * lax.rsqrt(var + ln_eps)
        out_ref[...] = (yn * ln_g_ref[...] + ln_b_ref[...]).astype(out_ref.dtype)


# --------------------------------------------------------------------------- #
# Parameter preparation (one-time layout plumbing, outside the forward)
# --------------------------------------------------------------------------- #
def prepare_sketch_layer_params(params, num_heads):
    """Transpose torch [out,in] Linear weights, fold 1/sqrt(head_dim) into Q, split
    Wo into head groups, cast matmul weights to bf16.  Call once, reuse per forward."""
    H = params["wq"].shape[0]
    I = params["b1"].shape[0]
    assert H % num_heads == 0
    head_dim = H // num_heads
    G = _heads_per_group(num_heads, head_dim, H)
    ng = num_heads // G
    gd = G * head_dim
    scale = 1.0 / math.sqrt(head_dim)

    return {
        "H": H, "I": I, "num_heads": num_heads, "head_dim": head_dim,
        "G": G, "ng": ng, "gd": gd,
        # QKV projection (Q scale folded)
        "wq": (params["wq"].T * scale).astype(jnp.bfloat16),
        "wk": params["wk"].T.astype(jnp.bfloat16),
        "wv": params["wv"].T.astype(jnp.bfloat16),
        "bq": (params["bq"] * scale).reshape(1, H).astype(jnp.float32),
        "bk": params["bk"].reshape(1, H).astype(jnp.float32),
        "bv": params["bv"].reshape(1, H).astype(jnp.float32),
        # attention output projection rows split per head group
        "wo": params["wo"].T.reshape(ng, gd, H).astype(jnp.bfloat16),
        "bo": params["bo"].reshape(1, H).astype(jnp.float32),
        "ln1_g": params["ln1_g"].reshape(1, H).astype(jnp.float32),
        "ln1_b": params["ln1_b"].reshape(1, H).astype(jnp.float32),
        # FFN
        "w1": params["w1"].T.astype(jnp.bfloat16),
        "b1": params["b1"].reshape(1, I).astype(jnp.float32),
        "w2": params["w2"].T.astype(jnp.bfloat16),
        "b2": params["b2"].reshape(1, H).astype(jnp.float32),
        "ln2_g": params["ln2_g"].reshape(1, H).astype(jnp.float32),
        "ln2_b": params["ln2_b"].reshape(1, H).astype(jnp.float32),
    }


# --------------------------------------------------------------------------- #
# pallas_call wrappers
# --------------------------------------------------------------------------- #
def _qkv_projection(x2d, prep, *, row_block, vmem_limit):
    R, H = x2d.shape
    tr = _pick_tile(R, row_block)
    out_sh = jax.ShapeDtypeStruct((R, H), jnp.bfloat16)
    return pl.pallas_call(
        _qkv_proj_kernel,
        out_shape=(out_sh, out_sh, out_sh),
        grid_spec=pltpu.PrefetchScalarGridSpec(
            num_scalar_prefetch=0,
            grid=(R // tr,),
            in_specs=[
                pl.BlockSpec((tr, H), lambda r: (r, 0)),                 # x rows
                _bspec((H, H), lambda r: (0, 0), single_buffer=True),    # Wq (scaled)
                _bspec((H, H), lambda r: (0, 0), single_buffer=True),    # Wk
                _bspec((H, H), lambda r: (0, 0), single_buffer=True),    # Wv
                _bspec((1, H), lambda r: (0, 0), single_buffer=True),    # bq (scaled)
                _bspec((1, H), lambda r: (0, 0), single_buffer=True),    # bk
                _bspec((1, H), lambda r: (0, 0), single_buffer=True),    # bv
            ],
            out_specs=[pl.BlockSpec((tr, H), lambda r: (r, 0)),
                       pl.BlockSpec((tr, H), lambda r: (r, 0)),
                       pl.BlockSpec((tr, H), lambda r: (r, 0))],
        ),
        compiler_params=pltpu.CompilerParams(
            dimension_semantics=("parallel",),
            vmem_limit_bytes=vmem_limit),
    )(x2d, prep["wq"], prep["wk"], prep["wv"], prep["bq"], prep["bk"], prep["bv"])


def _attention_block(x, q_bsh, k_bsh, v_bsh, mask3, prep, *, q_block, vmem_limit,
                     ln_eps):
    B, S, H = x.shape
    G, ng, gd, hd = prep["G"], prep["ng"], prep["gd"], prep["head_dim"]
    tq = _pick_tile(S, q_block)
    nq = S // tq

    kernel = functools.partial(_attn_kernel, heads_per_group=G, head_dim=hd,
                               ln_eps=ln_eps)
    # TODO(synk): for very long S (>~4k) on v7x, add a KV-tile axis with online
    # softmax instead of holding full-S K/V and [TQ,S] scores resident.
    return pl.pallas_call(
        kernel,
        out_shape=jax.ShapeDtypeStruct((B, S, H), x.dtype),
        grid_spec=pltpu.PrefetchScalarGridSpec(
            num_scalar_prefetch=0,
            grid=(B, nq, ng),
            in_specs=[
                pl.BlockSpec((1, tq, gd), lambda b, qi, hg: (b, qi, hg)),  # Q group
                pl.BlockSpec((1, S, gd), lambda b, qi, hg: (b, 0, hg)),    # K group
                pl.BlockSpec((1, S, gd), lambda b, qi, hg: (b, 0, hg)),    # V group
                pl.BlockSpec((1, tq, H), lambda b, qi, hg: (b, qi, 0)),    # residual x
                pl.BlockSpec((1, gd, H), lambda b, qi, hg: (hg, 0, 0)),    # Wo rows
                _bspec((1, H), lambda b, qi, hg: (0, 0), single_buffer=True),  # bo
                _bspec((1, H), lambda b, qi, hg: (0, 0), single_buffer=True),  # LN1 g
                _bspec((1, H), lambda b, qi, hg: (0, 0), single_buffer=True),  # LN1 b
                pl.BlockSpec((1, 1, S), lambda b, qi, hg: (b, 0, 0)),      # additive mask
            ],
            out_specs=pl.BlockSpec((1, tq, H), lambda b, qi, hg: (b, qi, 0)),
            scratch_shapes=[pltpu.VMEM((tq, H), jnp.float32)],             # group acc
        ),
        compiler_params=pltpu.CompilerParams(
            dimension_semantics=("parallel", "parallel", "arbitrary"),
            vmem_limit_bytes=vmem_limit),
    )(q_bsh, k_bsh, v_bsh, x, prep["wo"], prep["bo"], prep["ln1_g"], prep["ln1_b"],
      mask3)


def _ffn_block(x2d, prep, *, row_block, inter_block, vmem_limit, ln_eps):
    R, H = x2d.shape
    I = prep["I"]
    tr = _pick_tile(R, row_block)
    ti = _pick_tile(I, inter_block)

    kernel = functools.partial(_ffn_kernel, ln_eps=ln_eps)
    return pl.pallas_call(
        kernel,
        out_shape=jax.ShapeDtypeStruct((R, H), x2d.dtype),
        grid_spec=pltpu.PrefetchScalarGridSpec(
            num_scalar_prefetch=0,
            grid=(R // tr, I // ti),
            in_specs=[
                pl.BlockSpec((tr, H), lambda r, i: (r, 0)),     # tokens / residual
                pl.BlockSpec((H, ti), lambda r, i: (0, i)),     # W1 column tile
                pl.BlockSpec((1, ti), lambda r, i: (0, i)),     # b1 tile
                pl.BlockSpec((ti, H), lambda r, i: (i, 0)),     # W2 row tile
                _bspec((1, H), lambda r, i: (0, 0), single_buffer=True),   # b2
                _bspec((1, H), lambda r, i: (0, 0), single_buffer=True),   # LN2 gamma
                _bspec((1, H), lambda r, i: (0, 0), single_buffer=True),   # LN2 beta
            ],
            out_specs=pl.BlockSpec((tr, H), lambda r, i: (r, 0)),
            scratch_shapes=[pltpu.VMEM((tr, H), jnp.float32)],
        ),
        compiler_params=pltpu.CompilerParams(
            dimension_semantics=("parallel", "arbitrary"),
            vmem_limit_bytes=vmem_limit),
    )(x2d, prep["w1"], prep["b1"], prep["w2"], prep["b2"],
      prep["ln2_g"], prep["ln2_b"])


def sketch_layer_forward(hidden_states, attention_mask, prep, *,
                         q_block=None, row_block=None, inter_block=None,
                         ln_eps=_LN_EPS):
    """SketchLayer forward (eval mode).  hidden_states [B, S, H];
    attention_mask [B, 1, 1, S] additive (0 keep, -1e4 masked).
    `prep` comes from prepare_sketch_layer_params()."""
    B, S, H = hidden_states.shape
    vmem_limit = _vmem_limit_bytes()
    big_vmem = vmem_limit >= 80 * 1024 * 1024       # v5e/v6e (128 MiB) vs v7x (64 MiB)
    q_block = q_block or (512 if big_vmem else 256)
    row_block = row_block or (512 if big_vmem else 256)
    inter_block = inter_block or 512

    x2d = hidden_states.reshape(B * S, H)
    q2d, k2d, v2d = _qkv_projection(x2d, prep, row_block=row_block,
                                    vmem_limit=vmem_limit)
    q_bsh = q2d.reshape(B, S, H)
    k_bsh = k2d.reshape(B, S, H)
    v_bsh = v2d.reshape(B, S, H)

    mask3 = attention_mask.reshape(B, 1, S).astype(jnp.float32)
    attn = _attention_block(hidden_states, q_bsh, k_bsh, v_bsh, mask3, prep,
                            q_block=q_block, vmem_limit=vmem_limit, ln_eps=ln_eps)
    ffn = _ffn_block(attn.reshape(B * S, H), prep, row_block=row_block,
                     inter_block=inter_block, vmem_limit=vmem_limit, ln_eps=ln_eps)
    return ffn.reshape(B, S, H)


# --------------------------------------------------------------------------- #
# Pure-JAX f32 reference mirroring the PyTorch module (eval mode)
# --------------------------------------------------------------------------- #
def _reference(hidden_states, attention_mask, params, num_heads, eps=_LN_EPS):
    B, S, H = hidden_states.shape
    hd = H // num_heads

    def lin(x, w, b):
        return jnp.einsum("...h,oh->...o", x, w) + b

    def layernorm(x, g, b):
        mu = jnp.mean(x, axis=-1, keepdims=True)
        var = jnp.mean((x - mu) ** 2, axis=-1, keepdims=True)
        return (x - mu) * lax.rsqrt(var + eps) * g + b

    def split_heads(x):
        return x.reshape(B, S, num_heads, hd).transpose(0, 2, 1, 3)

    q = split_heads(lin(hidden_states, params["wq"], params["bq"]))
    k = split_heads(lin(hidden_states, params["wk"], params["bk"]))
    v = split_heads(lin(hidden_states, params["wv"], params["bv"]))

    scores = jnp.einsum("bhqd,bhkd->bhqk", q, k) / math.sqrt(hd)
    scores = scores + attention_mask
    probs = jax.nn.softmax(scores, axis=-1)
    ctx = jnp.einsum("bhqk,bhkd->bhqd", probs, v)
    ctx = ctx.transpose(0, 2, 1, 3).reshape(B, S, H)

    attn = lin(ctx, params["wo"], params["bo"])
    y1 = layernorm(attn + hidden_states, params["ln1_g"], params["ln1_b"])

    inter = jax.nn.gelu(lin(y1, params["w1"], params["b1"]), approximate=False)
    y2 = lin(inter, params["w2"], params["b2"])
    return layernorm(y2 + y1, params["ln2_g"], params["ln2_b"])


if __name__ == "__main__":
    B, S, H = 2, 8, 32
    num_heads = 4
    inter_dim = 64

    key = jax.random.PRNGKey(0)
    ks = jax.random.split(key, 16)

    def linear_init(kw, kb, out_dim, in_dim):
        bound = 1.0 / math.sqrt(in_dim)
        w = jax.random.uniform(kw, (out_dim, in_dim), jnp.float32, -bound, bound)
        b = jax.random.uniform(kb, (out_dim,), jnp.float32, -bound, bound)
        return w, b

    wq, bq = linear_init(ks[0], ks[1], H, H)
    wk, bk = linear_init(ks[2], ks[3], H, H)
    wv, bv = linear_init(ks[4], ks[5], H, H)
    wo, bo = linear_init(ks[6], ks[7], H, H)
    w1, b1 = linear_init(ks[8], ks[9], inter_dim, H)
    w2, b2 = linear_init(ks[10], ks[11], H, inter_dim)

    params = {
        "wq": wq, "bq": bq, "wk": wk, "bk": bk, "wv": wv, "bv": bv,
        "wo": wo, "bo": bo,
        "ln1_g": jnp.ones((H,), jnp.float32), "ln1_b": jnp.zeros((H,), jnp.float32),
        "w1": w1, "b1": b1, "w2": w2, "b2": b2,
        "ln2_g": jnp.ones((H,), jnp.float32), "ln2_b": jnp.zeros((H,), jnp.float32),
    }

    hidden_states = jax.random.normal(ks[12], (B, S, H), jnp.float32)
    keep = (jax.random.uniform(ks[13], (B, 1, 1, S)) > 0.2).astype(jnp.float32)
    attention_mask = (1.0 - keep) * (-10000.0)          # additive mask [B,1,1,S]

    prep = prepare_sketch_layer_params(params, num_heads)   # one-time weight re-layout
    out = sketch_layer_forward(hidden_states, attention_mask, prep)
    out = jax.block_until_ready(out)

    ref = _reference(hidden_states, attention_mask, params, num_heads)
    assert out.shape == (B, S, H)
    assert not bool(jnp.any(jnp.isnan(out)))
    # Kernels feed the MXU in bf16 (f32 accumulation) -> compare at bf16-level tolerance.
    assert jnp.allclose(out, ref, atol=5e-2, rtol=5e-2), (
        f"max abs err {float(jnp.max(jnp.abs(out - ref)))}")
    print("KERNEL_OK")
</pallas_src>

<mosaic_0001>
module attributes {stable_mosaic.version = 11 : i64} {
  func.func @_probe(%arg0: i32, %arg1: memref<8x128xf32, #tpu.memory_space<vmem>>, %arg2: memref<8x128xf32, #tpu.memory_space<vmem>>) attributes {dimension_semantics = [#tpu.dimension_semantics<arbitrary>], iteration_bounds = array<i64: 1>, scalar_prefetch = 0 : i64, scratch_operands = 0 : i64, tpu.core_type = #tpu.core_type<tc>, window_params = [{pipeline_mode = #tpu.pipeline_mode<synchronous>, transform_indices = @transform_0, window_bounds = array<i64: 8, 128>}, {pipeline_mode = #tpu.pipeline_mode<synchronous>, transform_indices = @transform_1, window_bounds = array<i64: 8, 128>}]} {
    %c0 = arith.constant 0 : index
    %c0_0 = arith.constant 0 : index
    %0 = vector.load %arg1[%c0, %c0_0] : memref<8x128xf32, #tpu.memory_space<vmem>>, vector<8x128xf32>
    %cst = arith.constant 1.000000e+00 : f32
    %1 = vector.broadcast %cst : f32 to vector<8x128xf32>
    %2 = arith.addf %0, %1 : vector<8x128xf32>
    %c0_1 = arith.constant 0 : index
    %c0_2 = arith.constant 0 : index
    %3 = vector.load %arg2[%c0_1, %c0_2] : memref<8x128xf32, #tpu.memory_space<vmem>>, vector<8x128xf32>
    tpu.vector_store %arg2[%c0_1, %c0_2], %2 {strides = array<i32>} : memref<8x128xf32, #tpu.memory_space<vmem>>, vector<8x128xf32>,
    return
  }
  func.func @transform_0(%arg0: i32) -> (i32, i32) {
    %c0_i32 = arith.constant 0 : i32
    %c0_i32_0 = arith.constant 0 : i32
    %c0_i32_1 = arith.constant 0 : i32
    return %c0_i32, %c0_i32_0 : i32, i32
  }
  func.func @transform_1(%arg0: i32) -> (i32, i32) {
    %c0_i32 = arith.constant 0 : i32
    %c0_i32_0 = arith.constant 0 : i32
    %c0_i32_1 = arith.constant 0 : i32
    return %c0_i32, %c0_i32_0 : i32, i32
  }
}

module attributes {stable_mosaic.version = 11 : i64} {
  func.func @_qkv_proj_kernel(%arg0: i32, %arg1: memref<16x32xf32, #tpu.memory_space<vmem>>, %arg2: memref<32x32xbf16, #tpu.memory_space<vmem>>, %arg3: memref<32x32xbf16, #tpu.memory_space<vmem>>, %arg4: memref<32x32xbf16, #tpu.memory_space<vmem>>, %arg5: memref<1x32xf32, #tpu.memory_space<vmem>>, %arg6: memref<1x32xf32, #tpu.memory_space<vmem>>, %arg7: memref<1x32xf32, #tpu.memory_space<vmem>>, %arg8: memref<16x32xbf16, #tpu.memory_space<vmem>>, %arg9: memref<16x32xbf16, #tpu.memory_space<vmem>>, %arg10: memref<16x32xbf16, #tpu.memory_space<vmem>>) attributes {dimension_semantics = [#tpu.dimension_semantics<parallel>], iteration_bounds = array<i64: 1>, scalar_prefetch = 0 : i64, scratch_operands = 0 : i64, tpu.core_type = #tpu.core_type<tc>, window_params = [{transform_indices = @transform_0, window_bounds = array<i64: 16, 32>}, {pipeline_mode = #tpu.pipeline_mode<synchronous>, transform_indices = @transform_1, window_bounds = array<i64: 32, 32>}, {pipeline_mode = #tpu.pipeline_mode<synchronous>, transform_indices = @transform_2, window_bounds = array<i64: 32, 32>}, {pipeline_mode = #tpu.pipeline_mode<synchronous>, transform_indices = @transform_3, window_bounds = array<i64: 32, 32>}, {pipeline_mode = #tpu.pipeline_mode<synchronous>, transform_indices = @transform_4, window_bounds = array<i64: 1, 32>}, {pipeline_mode = #tpu.pipeline_mode<synchronous>, transform_indices = @transform_5, window_bounds = array<i64: 1, 32>}, {pipeline_mode = #tpu.pipeline_mode<synchronous>, transform_indices = @transform_6, window_bounds = array<i64: 1, 32>}, {transform_indices = @transform_7, window_bounds = array<i64: 16, 32>}, {transform_indices = @transform_8, window_bounds = array<i64: 16, 32>}, {transform_indices = @transform_9, window_bounds = array<i64: 16, 32>}]} {
    %c0 = arith.constant 0 : index
    %c0_0 = arith.constant 0 : index
    %0 = vector.load %arg1[%c0, %c0_0] : memref<16x32xf32, #tpu.memory_space<vmem>>, vector<16x32xf32>
    %1 = arith.truncf %0 : vector<16x32xf32> to vector<16x32xbf16>
    %c0_1 = arith.constant 0 : index
    %c0_2 = arith.constant 0 : index
    %2 = vector.load %arg2[%c0_1, %c0_2] : memref<32x32xbf16, #tpu.memory_space<vmem>>, vector<32x32xbf16>
    %cst = arith.constant dense<0.000000e+00> : vector<16x32xf32>
    %3 = tpu.matmul %1, %2, %cst {dimension_numbers = #tpu.dot_dimension_numbers<[1], [0], [0], [1], [0, 0, 1, 1], [], []>} : vector<16x32xbf16>, vector<32x32xbf16>, vector<16x32xf32> -> vector<16x32xf32>
    %c0_3 = arith.constant 0 : index
    %c0_4 = arith.constant 0 : index
    %4 = vector.load %arg5[%c0_3, %c0_4] : memref<1x32xf32, #tpu.memory_space<vmem>>, vector<1x32xf32>
    %5 = vector.broadcast %4 : vector<1x32xf32> to vector<16x32xf32>
    %6 = arith.addf %3, %5 : vector<16x32xf32>
    %c0_5 = arith.constant 0 : index
    %c0_6 = arith.constant 0 : index
    %7 = vector.load %arg3[%c0_5, %c0_6] : memref<32x32xbf16, #tpu.memory_space<vmem>>, vector<32x32xbf16>
    %cst_7 = arith.constant dense<0.000000e+00> : vector<16x32xf32>
    %8 = tpu.matmul %1, %7, %cst_7 {dimension_numbers = #tpu.dot_dimension_numbers<[1], [0], [0], [1], [0, 0, 1, 1], [], []>} : vector<16x32xbf16>, vector<32x32xbf16>, vector<16x32xf32> -> vector<16x32xf32>
    %c0_8 = arith.constant 0 : index
    %c0_9 = arith.constant 0 : index
    %9 = vector.load %arg6[%c0_8, %c0_9] : memref<1x32xf32, #tpu.memory_space<vmem>>, vector<1x32xf32>
    %10 = vector.broadcast %9 : vector<1x32xf32> to vector<16x32xf32>
    %11 = arith.addf %8, %10 : vector<16x32xf32>
    %c0_10 = arith.constant 0 : index
    %c0_11 = arith.constant 0 : index
    %12 = vector.load %arg4[%c0_10, %c0_11] : memref<32x32xbf16, #tpu.memory_space<vmem>>, vector<32x32xbf16>
    %cst_12 = arith.constant dense<0.000000e+00> : vector<16x32xf32>
    %13 = tpu.matmul %1, %12, %cst_12 {dimension_numbers = #tpu.dot_dimension_numbers<[1], [0], [0], [1], [0, 0, 1, 1], [], []>} : vector<16x32xbf16>, vector<32x32xbf16>, vector<16x32xf32> -> vector<16x32xf32>
    %c0_13 = arith.constant 0 : index
    %c0_14 = arith.constant 0 : index
    %14 = vector.load %arg7[%c0_13, %c0_14] : memref<1x32xf32, #tpu.memory_space<vmem>>, vector<1x32xf32>
    %15 = vector.broadcast %14 : vector<1x32xf32> to vector<16x32xf32>
    %16 = arith.addf %13, %15 : vector<16x32xf32>
    %17 = arith.truncf %6 : vector<16x32xf32> to vector<16x32xbf16>
    %c0_15 = arith.constant 0 : index
    %c0_16 = arith.constant 0 : index
    %18 = vector.load %arg8[%c0_15, %c0_16] : memref<16x32xbf16, #tpu.memory_space<vmem>>, vector<16x32xbf16>
    tpu.vector_store %arg8[%c0_15, %c0_16], %17 {strides = array<i32>} : memref<16x32xbf16, #tpu.memory_space<vmem>>, vector<16x32xbf16>,
    %19 = arith.truncf %11 : vector<16x32xf32> to vector<16x32xbf16>
    %c0_17 = arith.constant 0 : index
    %c0_18 = arith.constant 0 : index
    %20 = vector.load %arg9[%c0_17, %c0_18] : memref<16x32xbf16, #tpu.memory_space<vmem>>, vector<16x32xbf16>
    tpu.vector_store %arg9[%c0_17, %c0_18], %19 {strides = array<i32>} : memref<16x32xbf16, #tpu.memory_space<vmem>>, vector<16x32xbf16>,
    %21 = arith.truncf %16 : vector<16x32xf32> to vector<16x32xbf16>
    %c0_19 = arith.constant 0 : index
    %c0_20 = arith.constant 0 : index
    %22 = vector.load %arg10[%c0_19, %c0_20] : memref<16x32xbf16, #tpu.memory_space<vmem>>, vector<16x32xbf16>
    tpu.vector_store %arg10[%c0_19, %c0_20], %21 {strides = array<i32>} : memref<16x32xbf16, #tpu.memory_space<vmem>>, vector<16x32xbf16>,
    return
  }
  func.func @transform_0(%arg0: i32) -> (i32, i32) {
    %c0_i32 = arith.constant 0 : i32
    %c0_i32_0 = arith.constant 0 : i32
    return %arg0, %c0_i32 : i32, i32
  }
  func.func @transform_1(%arg0: i32) -> (i32, i32) {
    %c0_i32 = arith.constant 0 : i32
    %c0_i32_0 = arith.constant 0 : i32
    %c0_i32_1 = arith.constant 0 : i32
    return %c0_i32, %c0_i32_0 : i32, i32
  }
  func.func @transform_2(%arg0: i32) -> (i32, i32) {
    %c0_i32 = arith.constant 0 : i32
    %c0_i32_0 = arith.constant 0 : i32
    %c0_i32_1 = arith.constant 0 : i32
    return %c0_i32, %c0_i32_0 : i32, i32
  }
  func.func @transform_3(%arg0: i32) -> (i32, i32) {
    %c0_i32 = arith.constant 0 : i32
    %c0_i32_0 = arith.constant 0 : i32
    %c0_i32_1 = arith.constant 0 : i32
    return %c0_i32, %c0_i32_0 : i32, i32
  }
  func.func @transform_4(%arg0: i32) -> (i32, i32) {
    %c0_i32 = arith.constant 0 : i32
    %c0_i32_0 = arith.constant 0 : i32
    %c0_i32_1 = arith.constant 0 : i32
    return %c0_i32, %c0_i32_0 : i32, i32
  }
  func.func @transform_5(%arg0: i32) -> (i32, i32) {
    %c0_i32 = arith.constant 0 : i32
    %c0_i32_0 = arith.constant 0 : i32
    %c0_i32_1 = arith.constant 0 : i32
    return %c0_i32, %c0_i32_0 : i32, i32
  }
  func.func @transform_6(%arg0: i32) -> (i32, i32) {
    %c0_i32 = arith.constant 0 : i32
    %c0_i32_0 = arith.constant 0 : i32
    %c0_i32_1 = arith.constant 0 : i32
    return %c0_i32, %c0_i32_0 : i32, i32
  }
  func.func @transform_7(%arg0: i32) -> (i32, i32) {
    %c0_i32 = arith.constant 0 : i32
    %c0_i32_0 = arith.constant 0 : i32
    return %arg0, %c0_i32 : i32, i32
  }
  func.func @transform_8(%arg0: i32) -> (i32, i32) {
    %c0_i32 = arith.constant 0 : i32
    %c0_i32_0 = arith.constant 0 : i32
    return %arg0, %c0_i32 : i32, i32
  }
  func.func @transform_9(%arg0: i32) -> (i32, i32) {
    %c0_i32 = arith.constant 0 : i32
    %c0_i32_0 = arith.constant 0 : i32
    return %arg0, %c0_i32 : i32, i32
  }
}

</mosaic_0001>

<bundles_post_ra>
// kernel: tpu_custom_call.1
= control target key start
LH: loop header
LB: loop body
LE: loop exit
PB: predicated region body
PF: predicated region fallthrough
CT: control target
= control target key end

     0   :  { %6 = vsyncpa [#allocation3], 0  ;;  %s103_s0 = inlined_call_operand.hbm [shape: f32[8,128], index: 0, kind: input, shape index: {}]   ;;  %s104_s1 = inlined_call_operand.hbm [shape: f32[8,128], index: 1, kind: output, shape index: {}]  }
   0x1   :  { %7 = vsyncpa [#allocation4], 0  ;;  %s85_s6 = smov [#allocation2]  }
   0x2   :  { %s14_s7 = sshll.u32 %s85_s6, 4  ;;  %s15_s7 = int_to_ptr.vmem [resolvable:$true] %s14_s7 }
   0x3   :  { %s49_s8 = scalar_lea.vmem %s15_s7, 128  ;;  %p54_p1 = scmp.lt.s32.totalorder %s15_s7, %s15_s7 }
   0x4   :  { %p50_p0 = scmp.ne.s32.totalorder %s15_s7, %s49_s8  ;;  %p55_p2 = scmp.lt.s32.totalorder %s49_s8, %s49_s8 }
   0x6   :  { %p56_p3 = por %p55_p2, %p54_p1 }
   0x8   :  { %p57_p4 = pnand %p56_p3, %p50_p0 }
   0xa   :  { %60 = shalt.err (!%p57_p4)
}
   0xb   :  { %17 = dma.hbm_to_vmem [thread:$0]  %s103_s0, 128, %s15_s7, [#allocation3]  }
   0xc   :  { %81 = dma.done.wait [#allocation3], 128  }
   0xd   :  { %82 = vsyncadd [#allocation3], 4294967168  ;;  %s86_s11 = smov [#allocation5]   ;;  %v21_v0 = vld [vmem:[#allocation2] sm:$0xff] }
   0xe   :  { %s30_s12 = sshll.u32 %s86_s11, 4  ;;  %v22_v1 = vadd.f32 1.0, %v21_v0  ;;  %s31_s12 = int_to_ptr.vmem [resolvable:$true] %s30_s12 }
   0xf   :  { %s61_s13 = scalar_lea.vmem %s31_s12, 128  ;;  %p66_p6 = scmp.lt.s32.totalorder %s31_s12, %s31_s12 }
  0x10   :  { %23 = vst [vmem:[#allocation5] sm:$0xff] %v22_v1  ;;  %p62_p5 = scmp.ne.s32.totalorder %s31_s12, %s61_s13  ;;  %p67_p7 = scmp.lt.s32.totalorder %s61_s13, %s61_s13 }
  0x12   :  { %p68_p8 = por %p67_p7, %p66_p6 }
  0x14   :  { %p69_p9 = pnand %p68_p8, %p62_p5 }
  0x16   :  { %72 = shalt.err (!%p69_p9)
}
  0x17   :  { %33 = dma.vmem_to_hbm [thread:$0]  %s31_s12, 128, %s104_s1, [#allocation4]  }
  0x18   :  { %83 = dma.done.wait [#allocation4], 128  }
  0x19   :  { %84 = vsyncadd [#allocation4], 4294967168 }
  0x1a   :  { %37 = vsyncpa [#allocation3], 1 }
  0x1b   :  { %38 = vsyncpa [#allocation4], 1 }

// kernel: tpu_custom_call.1
= control target key start
LH: loop header
LB: loop body
LE: loop exit
PB: predicated region body
PF: predicated region fallthrough
CT: control target
= control target key end

     0   :  { %15 = vsyncpa [#allocation3], 0  ;;  %s713_s0 = inlined_call_operand.hbm [shape: f32[16,32], index: 0, kind: input, shape index: {}]   ;;  %s714_s1 = inlined_call_operand.hbm [shape: bf16[32,32], index: 1, kind: input, shape index: {}]   ;;  %s715_s2 = inlined_call_operand.hbm [shape: bf16[32,32], index: 2, kind: input, shape index: {}]   ;;  %s716_s3 = inlined_call_operand.hbm [shape: bf16[32,32], index: 3, kind: input, shape index: {}]   ;;  %s717_s4 = inlined_call_operand.vmem [shape: f32[1,32], index: 4, kind: input, shape index: {}]   ;;  %s718_s5 = inlined_call_operand.vmem [shape: f32[1,32], index: 5, kind: input, shape index: {}]   ;;  %s719_s6 = inlined_call_operand.vmem [shape: f32[1,32], index: 6, kind: input, shape index: {}]   ;;  %s720_s7 = inlined_call_operand.hbm [shape: bf16[16,32], index: 7, kind: output, shape index: {0}]   ;;  %s721_s8 = inlined_call_operand.hbm [shape: bf16[16,32], index: 8, kind: output, shape index: {1}]   ;;  %s722_s9 = inlined_call_operand.hbm [shape: bf16[16,32], index: 9, kind: output, shape index: {2}]  }
   0x1   :  { %16 = vsyncpa [#allocation6], 0 }
   0x2   :  { %17 = vsyncpa [#allocation9], 0 }
   0x3   :  { %18 = vsyncpa [#allocation4], 0 }
   0x4   :  { %19 = vsyncpa [#allocation12], 0  ;;  %s593_s30 = smov [#allocation5]  }
   0x5   :  { %s37_s10 = sshll.u32 %s593_s30, 4  ;;  %s38_s10 = int_to_ptr.vmem [resolvable:$true] %s37_s10 }
   0x6   :  { %s451_s11 = scalar_lea.vmem %s38_s10, 256  ;;  %p456_p1 = scmp.lt.s32.totalorder %s38_s10, %s38_s10 }
   0x7   :  { %p452_p0 = scmp.ne.s32.totalorder %s38_s10, %s451_s11  ;;  %p457_p2 = scmp.lt.s32.totalorder %s451_s11, %s451_s11 }
   0x9   :  { %p458_p3 = por %p457_p2, %p456_p1 }
   0xb   :  { %p459_p4 = pnand %p458_p3, %p452_p0 }
   0xd   :  { %462 = shalt.err (!%p459_p4)
}
   0xe   :  { %s594_s12 = smov 64   ;;  %s595_s13 = smov 4  }
   0xf   :  { %43 = dma.hbm_to_vmem [thread:$0]  %s714_s1, 256, %s38_s10, [#allocation6], %s594_s12, %s594_s12, %s595_s13  }
  0x10   :  { %s596_s16 = smov [#allocation2]  }
  0x11   :  { %s25_s17 = sshll.u32 %s596_s16, 4  ;;  %s26_s17 = int_to_ptr.vmem [resolvable:$true] %s25_s17 }
  0x12   :  { %s471_s18 = scalar_lea.vmem %s26_s17, 256  ;;  %p476_p6 = scmp.lt.s32.totalorder %s26_s17, %s26_s17 }
  0x13   :  { %p472_p5 = scmp.ne.s32.totalorder %s26_s17, %s471_s18  ;;  %p477_p7 = scmp.lt.s32.totalorder %s471_s18, %s471_s18 }
  0x15   :  { %p478_p8 = por %p477_p7, %p476_p6 }
  0x17   :  { %p479_p9 = pnand %p478_p8, %p472_p5 }
  0x19   :  { %482 = shalt.err (!%p479_p9)
}
  0x1a   :  { %s597_s19 = smov 128   ;;  %s598_s20 = smov 8  }
  0x1b   :  { %31 = dma.hbm_to_vmem [thread:$0]  %s713_s0, 256, %s26_s17, [#allocation3], %s597_s19, %s597_s19, %s598_s20  }
  0x1c   :  { %s599_s23 = smov [#allocation7]   ;;  %s600_s25 = smov [#allocation8]  }
  0x1d   :  { %s49_s24 = sshll.u32 %s599_s23, 4  ;;  %s61_s1 = sshll.u32 %s600_s25, 4  ;;  %s50_s24 = int_to_ptr.vmem [resolvable:$true] %s49_s24  ;;  %s62_s1 = int_to_ptr.vmem [resolvable:$true] %s61_s1 }
  0x1e   :  { %s491_s26 = scalar_lea.vmem %s50_s24, 256  ;;  %p496_p11 = scmp.lt.s32.totalorder %s50_s24, %s50_s24 }
  0x1f   :  { %p492_p10 = scmp.ne.s32.totalorder %s50_s24, %s491_s26  ;;  %p497_p12 = scmp.lt.s32.totalorder %s491_s26, %s491_s26 }
  0x21   :  { %p498_p13 = por %p497_p12, %p496_p11 }
  0x23   :  { %p499_p0 = pnand %p498_p13, %p492_p10 }
  0x25   :  { %502 = shalt.err (!%p499_p0)
}
  0x26   :  { %55 = dma.hbm_to_vmem [thread:$0]  %s715_s2, 256, %s50_s24, [#allocation6], %s594_s12, %s594_s12, %s595_s13  }
  0x27   :  { %s511_s0 = scalar_lea.vmem %s62_s1, 256  ;;  %p516_p2 = scmp.lt.s32.totalorder %s62_s1, %s62_s1 }
  0x28   :  { %p512_p1 = scmp.ne.s32.totalorder %s62_s1, %s511_s0  ;;  %p517_p3 = scmp.lt.s32.totalorder %s511_s0, %s511_s0 }
  0x2a   :  { %p518_p4 = por %p517_p3, %p516_p2 }
  0x2c   :  { %p519_p5 = pnand %p518_p4, %p512_p1 }
  0x2e   :  { %522 = shalt.err (!%p519_p5)
}
  0x2f   :  { %67 = dma.hbm_to_vmem [thread:$0]  %s716_s3, 256, %s62_s1, [#allocation9], %s594_s12, %s594_s12, %s595_s13  }
  0x30   :  { %583 = dma.done.wait [#allocation3], 256  }
  0x31   :  { %584 = vsyncadd [#allocation3], 4294967040 }
  0x32   :  { %585 = dma.done.wait [#allocation6], 512  }
  0x33   :  { %586 = vsyncadd [#allocation6], 4294966784 }
  0x34   :  { %587 = dma.done.wait [#allocation9], 256  }
  0x35   :  { %588 = vsyncadd [#allocation9], 4294967040  ;;  %v601_v0 = vmov 0.0   ;;  %vm602_vm0 = vmmov 0   ;;  %v437_v1 = vld [vmem:[#allocation5 + $0x8] sm:$0xff]   ;;  %v438_v2 = vld [vmem:[#allocation7 + $0x8] sm:$0xff]  }
  0x36   :  { %400 = vmatprep.subr.bf16.mxu0 %v601_v0  ;;  %408 = vmatprep.subr.bf16.mxu1 %v601_v0  ;;  %v439_v3 = vld [vmem:[#allocation5] sm:$0xff]   ;;  %v440_v4 = vld [vmem:[#allocation7] sm:$0xff]   ;;  %v88_v6 = vld [vmem:[#allocation2 + $0x8] sm:$0xff]  ;;  %vm113_vm1 = vcmask 261120   ;;  %vm294_vm2 = vcmask 257024   ;;  %s603_s14 = smov [#allocation10]  }
  0x37   :  { %404 = vmatprep.mubr.msk.bf16.mxu0 %vm602_vm0, %v601_v0  ;;  %412 = vmatprep.mubr.msk.bf16.mxu1 %vm602_vm0, %v601_v0  ;;  %v87_v5 = vld [vmem:[#allocation2] sm:$0xff]  ;;  %v441_v8 = vld [vmem:[#allocation8 + $0x8] sm:$0xff]   ;;  %v442_v9 = vld [vmem:[#allocation8] sm:$0xff]   ;;  %s322_s15 = sshll.u32 %s603_s14, 4  ;;  %s323_s15 = int_to_ptr.vmem [resolvable:$true] %s322_s15 }
  0x38   :  { %401 = vmatpush3.bf16.msra.mxu0 %v437_v1  ;;  %409 = vmatpush3.bf16.msra.mxu1 %v438_v2  ;;  %v89_v7 = vpack.c.bf16 %v88_v6, %v87_v5  ;;  %v367_v10 = vld [vmem:[%s717_s4] ss:$0 sm:$0xff]  ;;  %s604_s4 = smov [#allocation11]   ;;  %s523_s18 = scalar_lea.vmem %s323_s15, 128 }
  0x39   :  { %402 = vmatprep.subr.bf16.mxu0 %v601_v0  ;;  %410 = vmatprep.subr.bf16.mxu1 %v601_v0  ;;  %v371_v11 = vld [vmem:[%s718_s5] ss:$0 sm:$0xff]  ;;  %s334_s16 = sshll.u32 %s604_s4, 4  ;;  %p524_p6 = scmp.ne.s32.totalorder %s323_s15, %s523_s18  ;;  %s335_s16 = int_to_ptr.vmem [resolvable:$true] %s334_s16 }
  0x3a   :  { %v375_v25 = vld [vmem:[%s719_s6] ss:$0 sm:$0xff]  ;;  %p528_p7 = scmp.lt.s32.totalorder %s323_s15, %s323_s15  ;;  %p529_p8 = scmp.lt.s32.totalorder %s523_s18, %s523_s18 }
  0x3c   :  { %403 = vmatpush3.bf16.msra.mxu0 %v439_v3  ;;  %411 = vmatpush3.bf16.msra.mxu1 %v440_v4  ;;  %p530_p9 = por %p529_p8, %p528_p7 }
  0x3d   :  { %416 = vmatprep.subr.bf16.mxu0 %v601_v0 }
  0x3e   :  { %p531_p10 = pnand %p530_p9, %p524_p6 }
  0x3f   :  { %405 = vmatmul.mubr.msk.bf16.vlgmr.msra.gmra.mxu0 %vm113_vm1, %v89_v7  ;;  %413 = vmatmul.mubr.msk.bf16.vlgmr.msra.gmra.mxu1 %vm113_vm1, %v89_v7 }
  0x40   :  { %417 = vmatpush3.bf16.msra.mxu0 %v441_v8  ;;  %420 = vmatprep.mubr.msk.bf16.mxu0 %vm602_vm0, %v601_v0 }
  0x41   :  { %418 = vmatprep.subr.bf16.mxu0 %v601_v0 }
  0x44   :  { %419 = vmatpush3.bf16.msra.mxu0 %v442_v9 }
  0x47   :  { %421 = vmatmul.mubr.msk.bf16.vlgmr.msra.gmra.mxu0 %vm113_vm1, %v89_v7 }
  0xff   :  { %v151_v12 = vpop.f32.mrf.mxu0  ;;  %v215_v14 = vpop.f32.mrf.mxu1 }
 0x100   :  { %v152_v13 = vadd.f32 %v367_v10, %v151_v12  ;;  %v216_v16 = vadd.f32 %v371_v11, %v215_v14 }
 0x101   :  { %v406_v15 = vpop.f32.mrf.mxu0  ;;  %v414_v18 = vpop.f32.mrf.mxu1 }
 0x102   :  { %v385_v17 = vpack.c.bf16 %v152_v13, %v152_v13  ;;  %v387_v19 = vpack.c.bf16 %v216_v16, %v216_v16 }
 0x103   :  { %v154_v20 = vpop.f32.mrf.mxu0  ;;  %v218_v22 = vpop.f32.mrf.mxu1 }
 0x104   :  { %v155_v21 = vadd.f32 %v367_v10, %v154_v20  ;;  %295 = vst.msk [vmem:[#allocation10] sm:$0xf] %vm294_vm2, %v385_v17  ;;  %v219_v24 = vadd.f32 %v371_v11, %v218_v22  ;;  %305 = vst.msk [vmem:[#allocation11] sm:$0xf] %vm294_vm2, %v387_v19 }
 0x105   :  { %v407_v23 = vpop.f32.mrf.mxu0  ;;  %v415_v27 = vpop.f32.mrf.mxu1 }
 0x106   :  { %v386_v26 = vpack.c.bf16 %v155_v21, %v155_v21  ;;  %v388_v28 = vpack.c.bf16 %v219_v24, %v219_v24 }
 0x107   :  { %v279_v29 = vpop.f32.mrf.mxu0 }
 0x108   :  { %v280_v30 = vadd.f32 %v375_v25, %v279_v29  ;;  %296 = vst.msk [vmem:[#allocation10 + $0x4] sm:$0xf] %vm294_vm2, %v386_v26  ;;  %306 = vst.msk [vmem:[#allocation11 + $0x4] sm:$0xf] %vm294_vm2, %v388_v28 }
 0x109   :  { %v422_v31 = vpop.f32.mrf.mxu0 }
 0x10a   :  { %534 = shalt.err (!%p531_p10)
}
 0x10b   :  { %328 = dma.vmem_to_hbm [thread:$0]  %s323_s15, 128, %s720_s7, [#allocation4], %s594_s12, %s594_s12, %s595_s13   ;;  %v389_v32 = vpack.c.bf16 %v280_v30, %v280_v30 }
 0x10c   :  { %s543_s20 = scalar_lea.vmem %s335_s16, 128  ;;  %p548_p12 = scmp.lt.s32.totalorder %s335_s16, %s335_s16 }
 0x10d   :  { %p544_p11 = scmp.ne.s32.totalorder %s335_s16, %s543_s20  ;;  %p549_p13 = scmp.lt.s32.totalorder %s543_s20, %s543_s20 }
 0x10f   :  { %p550_p0 = por %p549_p13, %p548_p12 }
 0x111   :  { %p551_p1 = pnand %p550_p0, %p544_p11 }
 0x113   :  { %554 = shalt.err (!%p551_p1)
}
 0x114   :  { %340 = dma.vmem_to_hbm [thread:$0]  %s335_s16, 128, %s721_s8, [#allocation12], %s594_s12, %s594_s12, %s595_s13   ;;  %v282_v33 = vpop.f32.mrf.mxu0  ;;  %315 = vst.msk [vmem:[#allocation13] sm:$0xf] %vm294_vm2, %v389_v32 }
 0x115   :  { %s605_s23 = smov [#allocation13]   ;;  %v283_v34 = vadd.f32 %v375_v25, %v282_v33 }
 0x116   :  { %s346_s24 = sshll.u32 %s605_s23, 4  ;;  %v423_v35 = vpop.f32.mrf.mxu0  ;;  %s347_s24 = int_to_ptr.vmem [resolvable:$true] %s346_s24 }
 0x117   :  { %v390_v36 = vpack.c.bf16 %v283_v34, %v283_v34  ;;  %s563_s7 = scalar_lea.vmem %s347_s24, 128  ;;  %p568_p3 = scmp.lt.s32.totalorder %s347_s24, %s347_s24 }
 0x118   :  { %p564_p2 = scmp.ne.s32.totalorder %s347_s24, %s563_s7  ;;  %p569_p4 = scmp.lt.s32.totalorder %s563_s7, %s563_s7 }
 0x119   :  { %316 = vst.msk [vmem:[#allocation13 + $0x4] sm:$0xf] %vm294_vm2, %v390_v36 }
 0x11a   :  { %p570_p5 = por %p569_p4, %p568_p3 }
 0x11c   :  { %p571_p6 = pnand %p570_p5, %p564_p2 }
 0x11e   :  { %574 = shalt.err (!%p571_p6)
}
 0x11f   :  { %352 = dma.vmem_to_hbm [thread:$0]  %s347_s24, 128, %s722_s9, [#allocation12], %s594_s12, %s594_s12, %s595_s13  }
 0x120   :  { %589 = dma.done.wait [#allocation4], 128  }
 0x121   :  { %590 = vsyncadd [#allocation4], 4294967168 }
 0x122   :  { %591 = dma.done.wait [#allocation12], 256  }
 0x123   :  { %592 = vsyncadd [#allocation12], 4294967040 }
 0x124   :  { %362 = vsyncpa [#allocation3], 1 }
 0x125   :  { %363 = vsyncpa [#allocation6], 1 }
 0x126   :  { %364 = vsyncpa [#allocation9], 1 }
 0x127   :  { %365 = vsyncpa [#allocation4], 1 }
 0x128   :  { %366 = vsyncpa [#allocation12], 1 }

</bundles_post_ra>
